<compile_context>
chip_gen: v6e
topology: v6e:2x2x1
jax: 0.10.0
libtpu: 0.0.40
codegen_flags: <defaults>
</compile_context>

<pallas_src>
import math

import jax
import jax.numpy as jnp
from jax import lax
from jax.experimental import pallas as pl
from jax.experimental.pallas import tpu as pltpu


def _round_up(n, m):
    return ((n + m - 1) // m) * m


def _logreg_kernel(x_ref, w_ref, b_ref, probas_ref, logits_ref):
    # x_ref: (TB, F) input dtype (bf16 or f32), w_ref: (C, F), b_ref: (1, C).
    # Contract on F for both operands (x @ W.T) -> (TB, C), f32 accumulation
    # on the MXU; bias add (VPU) + sigmoid (EUP) stay in f32.
    logits = lax.dot_general(
        x_ref[...], w_ref[...],
        dimension_numbers=(((1,), (1,)), ((), ())),
        preferred_element_type=jnp.float32,
    ) + b_ref[...]
    logits_ref[...] = logits
    probas_ref[...] = jax.nn.sigmoid(logits)


def logreg_forward(x, weight, bias, *, block_b=512):
    """x: (B, F); weight: (C, F); bias: (C,).

    Returns (probas, logits), both float32, shape (B, C)."""
    B, F = x.shape
    C, F2 = weight.shape
    assert F == F2, "weight must be (num_classes, num_features)"

    # torch does x.float(); we keep bf16 in bf16 to halve HBM traffic (f32
    # accumulation preserves the f32 logits), everything else is cast to f32.
    if x.dtype == jnp.bfloat16:
        w = weight.astype(jnp.bfloat16)
    else:
        x = x.astype(jnp.float32)
        w = weight.astype(jnp.float32)
    b2d = bias.astype(jnp.float32).reshape(1, C)

    # Tile the batch dim; keep the tile a multiple of 8 (sublane) and pad B so
    # the grid divides evenly.  Padded zero-rows are sliced off afterwards.
    tb = min(block_b, _round_up(B, 8))
    Bp = _round_up(B, tb)
    if Bp != B:
        x = jnp.pad(x, ((0, Bp - B), (0, 0)))
    grid = (Bp // tb,)

    itemsize = jnp.dtype(x.dtype).itemsize
    cost = pl.CostEstimate(
        flops=2 * Bp * F * C,
        transcendentals=Bp * C,
        bytes_accessed=(Bp * F * itemsize              # x stream
                        + C * F * itemsize + 4 * C     # weight + bias
                        + 2 * Bp * C * 4),             # probas + logits
    )

    # TODO(synk): for very large F, add a K-reduction grid axis (tile F) with
    # an f32 VMEM accumulator + pl.when init/finalize to bound the working set.
    probas, logits = pl.pallas_call(
        _logreg_kernel,
        grid=grid,
        in_specs=[
            pl.BlockSpec((tb, F), lambda i: (i, 0)),   # x tile (streamed)
            pl.BlockSpec((C, F), lambda i: (0, 0)),    # weight (resident)
            pl.BlockSpec((1, C), lambda i: (0, 0)),    # bias (resident)
        ],
        out_specs=(
            pl.BlockSpec((tb, C), lambda i: (i, 0)),   # probas
            pl.BlockSpec((tb, C), lambda i: (i, 0)),   # logits
        ),
        out_shape=(
            jax.ShapeDtypeStruct((Bp, C), jnp.float32),
            jax.ShapeDtypeStruct((Bp, C), jnp.float32),
        ),
        compiler_params=pltpu.CompilerParams(
            dimension_semantics=("parallel",),          # megacore on v7x
            vmem_limit_bytes=32 * 1024 * 1024,          # explicit, safe on v5e..v7x
        ),
        cost_estimate=cost,
    )(x, w, b2d)

    if Bp != B:
        probas = probas[:B]
        logits = logits[:B]
    return probas, logits


def init_logreg_params(num_features, num_classes, seed=123):
    """Deterministic init matching torch.nn.Linear's scheme:
    U(-1/sqrt(fan_in), 1/sqrt(fan_in)) for both weight and bias."""
    key = jax.random.PRNGKey(seed)
    kw, kb = jax.random.split(key)
    bound = 1.0 / math.sqrt(num_features)
    weight = jax.random.uniform(kw, (num_classes, num_features),
                                jnp.float32, -bound, bound)
    bias = jax.random.uniform(kb, (num_classes,), jnp.float32, -bound, bound)
    return weight, bias


if __name__ == "__main__":
    # Small, forward-consistent shapes: batch=8 samples, 32 features, 4 classes.
    B, F, C = 8, 32, 4

    weight, bias = init_logreg_params(F, C, seed=123)
    x = jax.random.normal(jax.random.PRNGKey(0), (B, F), jnp.float32)

    probas, logits = logreg_forward(x, weight, bias)
    jax.block_until_ready((probas, logits))

    # Sanity check against plain JAX reference (pure f32 path -> tight tol).
    ref_logits = x @ weight.T + bias
    ref_probas = jax.nn.sigmoid(ref_logits)
    assert logits.shape == (B, C) and probas.shape == (B, C)
    assert jnp.allclose(logits, ref_logits, atol=1e-5)
    assert jnp.allclose(probas, ref_probas, atol=1e-5)

    # Also exercise the bf16 fast path and a non-tile-divisible / gridded batch.
    xb = jax.random.normal(jax.random.PRNGKey(1), (1000, F), jnp.bfloat16)
    pb, lb = logreg_forward(xb, weight, bias, block_b=256)
    jax.block_until_ready((pb, lb))
    ref_lb = xb.astype(jnp.float32) @ weight.T + bias
    assert jnp.allclose(lb, ref_lb, atol=2e-2, rtol=2e-2)  # bf16 input rounding
    assert pb.shape == (1000, C) and lb.shape == (1000, C)

    print("KERNEL_OK")
</pallas_src>

<mosaic_0001>
module attributes {stable_mosaic.version = 11 : i64} {
  func.func @_logreg_kernel(%arg0: i32, %arg1: memref<8x32xf32, #tpu.memory_space<vmem>>, %arg2: memref<4x32xf32, #tpu.memory_space<vmem>>, %arg3: memref<1x4xf32, #tpu.memory_space<vmem>>, %arg4: memref<8x4xf32, #tpu.memory_space<vmem>>, %arg5: memref<8x4xf32, #tpu.memory_space<vmem>>) attributes {dimension_semantics = [#tpu.dimension_semantics<parallel>], iteration_bounds = array<i64: 1>, scalar_prefetch = 0 : i64, scratch_operands = 0 : i64, tpu.core_type = #tpu.core_type<tc>, window_params = [{transform_indices = @transform_0, window_bounds = array<i64: 8, 32>}, {pipeline_mode = #tpu.pipeline_mode<synchronous>, transform_indices = @transform_1, window_bounds = array<i64: 4, 32>}, {pipeline_mode = #tpu.pipeline_mode<synchronous>, transform_indices = @transform_2, window_bounds = array<i64: 1, 4>}, {transform_indices = @transform_3, window_bounds = array<i64: 8, 4>}, {transform_indices = @transform_4, window_bounds = array<i64: 8, 4>}]} {
    %c0 = arith.constant 0 : index
    %c0_0 = arith.constant 0 : index
    %0 = vector.load %arg1[%c0, %c0_0] : memref<8x32xf32, #tpu.memory_space<vmem>>, vector<8x32xf32>
    %c0_1 = arith.constant 0 : index
    %c0_2 = arith.constant 0 : index
    %1 = vector.load %arg2[%c0_1, %c0_2] : memref<4x32xf32, #tpu.memory_space<vmem>>, vector<4x32xf32>
    %cst = arith.constant dense<0.000000e+00> : vector<8x4xf32>
    %2 = tpu.matmul %0, %1, %cst {dimension_numbers = #tpu.dot_dimension_numbers<[1], [1], [0], [0], [0, 0, 1, 0], [], []>} : vector<8x32xf32>, vector<4x32xf32>, vector<8x4xf32> -> vector<8x4xf32>
    %c0_3 = arith.constant 0 : index
    %c0_4 = arith.constant 0 : index
    %3 = vector.load %arg3[%c0_3, %c0_4] : memref<1x4xf32, #tpu.memory_space<vmem>>, vector<1x4xf32>
    %4 = vector.broadcast %3 : vector<1x4xf32> to vector<8x4xf32>
    %5 = arith.addf %2, %4 : vector<8x4xf32>
    %c0_5 = arith.constant 0 : index
    %c0_6 = arith.constant 0 : index
    %6 = vector.load %arg5[%c0_5, %c0_6] : memref<8x4xf32, #tpu.memory_space<vmem>>, vector<8x4xf32>
    tpu.vector_store %arg5[%c0_5, %c0_6], %5 {strides = array<i32>} : memref<8x4xf32, #tpu.memory_space<vmem>>, vector<8x4xf32>,
    %7 = arith.negf %5 : vector<8x4xf32>
    %8 = math.exp %7 : vector<8x4xf32>
    %cst_7 = arith.constant 1.000000e+00 : f32
    %9 = vector.broadcast %cst_7 : f32 to vector<8x4xf32>
    %10 = arith.addf %9, %8 : vector<8x4xf32>
    %11 = arith.divf %9, %10 : vector<8x4xf32>
    %c0_8 = arith.constant 0 : index
    %c0_9 = arith.constant 0 : index
    %12 = vector.load %arg4[%c0_8, %c0_9] : memref<8x4xf32, #tpu.memory_space<vmem>>, vector<8x4xf32>
    tpu.vector_store %arg4[%c0_8, %c0_9], %11 {strides = array<i32>} : memref<8x4xf32, #tpu.memory_space<vmem>>, vector<8x4xf32>,
    return
  }
  func.func @transform_0(%arg0: i32) -> (i32, i32) {
    %c0_i32 = arith.constant 0 : i32
    %c0_i32_0 = arith.constant 0 : i32
    return %arg0, %c0_i32 : i32, i32
  }
  func.func @transform_1(%arg0: i32) -> (i32, i32) {
    %c0_i32 = arith.constant 0 : i32
    %c0_i32_0 = arith.constant 0 : i32
    %c0_i32_1 = arith.constant 0 : i32
    return %c0_i32, %c0_i32_0 : i32, i32
  }
  func.func @transform_2(%arg0: i32) -> (i32, i32) {
    %c0_i32 = arith.constant 0 : i32
    %c0_i32_0 = arith.constant 0 : i32
    %c0_i32_1 = arith.constant 0 : i32
    return %c0_i32, %c0_i32_0 : i32, i32
  }
  func.func @transform_3(%arg0: i32) -> (i32, i32) {
    %c0_i32 = arith.constant 0 : i32
    %c0_i32_0 = arith.constant 0 : i32
    return %arg0, %c0_i32 : i32, i32
  }
  func.func @transform_4(%arg0: i32) -> (i32, i32) {
    %c0_i32 = arith.constant 0 : i32
    %c0_i32_0 = arith.constant 0 : i32
    return %arg0, %c0_i32 : i32, i32
  }
}

</mosaic_0001>

<bundles_post_ra>
// kernel: tpu_custom_call.1
= control target key start
LH: loop header
LB: loop body
LE: loop exit
PB: predicated region body
PF: predicated region fallthrough
CT: control target
= control target key end

     0   :  { %10 = vsyncpa [#allocation3], 0  ;;  %s252_s0 = inlined_call_operand.hbm [shape: f32[8,32], index: 0, kind: input, shape index: {}]   ;;  %s253_s1 = inlined_call_operand.hbm [shape: f32[4,32], index: 1, kind: input, shape index: {}]   ;;  %s254_s2 = inlined_call_operand.vmem [shape: f32[1,4], index: 2, kind: input, shape index: {}]   ;;  %s255_s3 = inlined_call_operand.vmem [shape: f32[8,4], index: 3, kind: output, shape index: {0}]   ;;  %s256_s4 = inlined_call_operand.vmem [shape: f32[8,4], index: 4, kind: output, shape index: {1}]  }
   0x1   :  { %11 = vsyncpa [#allocation5], 0  ;;  %s208_s15 = smov [#allocation2]   ;;  %s209_s17 = smov [#allocation4]  }
   0x2   :  { %s18_s16 = sshll.u32 %s208_s15, 4  ;;  %s28_s18 = sshll.u32 %s209_s17, 4  ;;  %s19_s16 = int_to_ptr.vmem [resolvable:$true] %s18_s16  ;;  %s29_s18 = int_to_ptr.vmem [resolvable:$true] %s28_s18 }
   0x3   :  { %s172_s19 = scalar_lea.vmem %s19_s16, 128  ;;  %p177_p1 = scmp.lt.s32.totalorder %s19_s16, %s19_s16 }
   0x4   :  { %p173_p0 = scmp.ne.s32.totalorder %s19_s16, %s172_s19  ;;  %p178_p2 = scmp.lt.s32.totalorder %s172_s19, %s172_s19 }
   0x6   :  { %p179_p3 = por %p178_p2, %p177_p1 }
   0x8   :  { %p180_p4 = pnand %p179_p3, %p173_p0 }
   0xa   :  { %183 = shalt.err (!%p180_p4)
}
   0xb   :  { %21 = dma.hbm_to_vmem [thread:$0]  %s252_s0, 128, %s19_s16, [#allocation3]  }
   0xc   :  { %s192_s22 = scalar_lea.vmem %s29_s18, 64  ;;  %p197_p6 = scmp.lt.s32.totalorder %s29_s18, %s29_s18 }
   0xd   :  { %p193_p5 = scmp.ne.s32.totalorder %s29_s18, %s192_s22  ;;  %p198_p7 = scmp.lt.s32.totalorder %s192_s22, %s192_s22 }
   0xf   :  { %p199_p8 = por %p198_p7, %p197_p6 }
  0x11   :  { %p200_p9 = pnand %p199_p8, %p193_p5 }
  0x13   :  { %203 = shalt.err (!%p200_p9)
}
  0x14   :  { %31 = dma.hbm_to_vmem [thread:$0]  %s253_s1, 64, %s29_s18, [#allocation5]  }
  0x15   :  { %204 = dma.done.wait [#allocation3], 128  }
  0x16   :  { %205 = vsyncadd [#allocation3], 4294967168 }
  0x17   :  { %206 = dma.done.wait [#allocation5], 64  }
  0x18   :  { %207 = vsyncadd [#allocation5], 4294967232  ;;  %v210_v0 = vmov 0.0   ;;  %vm211_vm0 = vmmov 0   ;;  %vm49_vm1 = vcmask 261120   ;;  %v40_v2 = vld [vmem:[#allocation2] sm:$0xff] }
  0x19   :  { %151 = vmatprep.subr.mxu0 %v210_v0  ;;  %153 = vmatprep.mubr.msk.f32.mxu0 %vm211_vm0, %v210_v0  ;;  %v41_v1 = vld [vmem:[#allocation4] sm:$0xf]  ;;  %v145_v3 = vld [vmem:[%s254_s2] ss:$0 sm:$0xff]  ;;  %vm126_vm2 = vcmask 31744  }
  0x1a   :  { %152 = vmatpush3.xpose.msk.msra.mxu0 %vm49_vm1, %v41_v1 }
  0x1d   :  { %154 = vmatmul.mubr.msk.f32.vlgmr.msra.gmra.mxu0 %vm49_vm1, %v40_v2 }
  0xdd   :  { %v122_v4 = vpop.f32.mrf.mxu0 }
  0xde   :  { %v123_v5 = vadd.f32 %v145_v3, %v122_v4 }
  0xdf   :  { %v155_v6 = vpop.f32.mrf.mxu0 }
  0xe0   :  { %127 = vst.msk [vmem:[%s256_s4] sm:$0xff] %vm126_vm2, %v123_v5  ;;  %v148_v7 = vmul.f32 -1.442695, %v123_v5 }
  0xe2   :  { %160 = vpow2.f32 %v148_v7 }
  0xef   :  { %v161_v8 = vpop.eup %160 }
  0xf0   :  { %v131_v9 = vadd.f32 1.0, %v161_v8 }
  0xf2   :  { %162 = vrcp.f32 %v131_v9 }
  0xff   :  { %v163_v10 = vpop.eup %162 }
 0x100   :  { %134 = vst.msk [vmem:[%s255_s3] sm:$0xff] %vm126_vm2, %v163_v10 }
 0x101   :  { %143 = vsyncpa [#allocation3], 1 }
 0x102   :  { %144 = vsyncpa [#allocation5], 1 }

</bundles_post_ra>
